<compile_context>
chip_gen: v7x
topology: tpu7x:2x2x1
jax: 0.10.0
libtpu: 0.0.40
codegen_flags: <defaults>
</compile_context>

<pallas_src>
import jax
import jax.numpy as jnp
from jax.experimental import pallas as pl
from jax.experimental.pallas import tpu as pltpu

LANES = 128
CHUNK_ROWS = 512      # inner-loop chunk: (512,128) f32 = 64 vregs per input


def _round_up(x, m):
    return ((x + m - 1) // m) * m


def _chip_config():
    """Generation-aware (num_cores, max_tile_rows, vmem_limit_bytes)."""
    try:
        vmem_bytes = int(pltpu.get_tpu_info().vmem_capacity_bytes)
    except Exception:
        # Conservative fallback that is safe on every generation.
        return 1, 8192, 40 * 1024 * 1024
    if vmem_bytes >= 100 * 1024 * 1024:
        # v5e / v6e: 128 MiB VMEM, single TensorCore.
        return 1, 16384, 96 * 1024 * 1024
    # v7x-like: 64 MiB VMEM, 2 TensorCores.
    return 2, 8192, 40 * 1024 * 1024


def _make_kernel(rows, tile_rows, steps_per_core, chunk_rows, mask_needed):
    n_full_chunks = tile_rows // chunk_rows
    tail_rows = tile_rows - n_full_chunks * chunk_rows

    def kernel(pred_ref, target_ref, acc_ref):
        c = pl.program_id(0)
        i = pl.program_id(1)

        @pl.when(i == 0)
        def _():
            acc_ref[...] = jnp.zeros_like(acc_ref)

        row0 = (c * steps_per_core + i) * tile_rows

        def chunk_contrib(off, size, masked, carry):
            tp_a, fn_a, fp_a = carry
            p = pred_ref[pl.ds(off, size), :].astype(jnp.float32)
            t = target_ref[pl.ds(off, size), :].astype(jnp.float32)
            if masked:
                rid = jax.lax.broadcasted_iota(jnp.int32, (size, LANES), 0)
                valid = (rid + (row0 + off)) < rows
                p = jnp.where(valid, p, 0.0)
                t = jnp.where(valid, t, 0.0)
            tp_c = p * t
            fn_c = t - tp_c          # t * (1 - p)
            fp_c = p - tp_c          # (1 - t) * p
            tp_a = tp_a + tp_c.reshape(-1, 8, LANES).sum(axis=0)
            fn_a = fn_a + fn_c.reshape(-1, 8, LANES).sum(axis=0)
            fp_a = fp_a + fp_c.reshape(-1, 8, LANES).sum(axis=0)
            return tp_a, fn_a, fp_a

        def process(masked):
            zero = jnp.zeros((8, LANES), jnp.float32)
            carry = (zero, zero, zero)
            if n_full_chunks > 0:
                def body(j, cy):
                    off = pl.multiple_of(j * chunk_rows, chunk_rows)
                    return chunk_contrib(off, chunk_rows, masked, cy)
                carry = jax.lax.fori_loop(0, n_full_chunks, body, carry,
                                          unroll=True)
            if tail_rows > 0:
                carry = chunk_contrib(n_full_chunks * chunk_rows, tail_rows,
                                      masked, carry)
            tp_a, fn_a, fp_a = carry
            acc_ref[0] += tp_a
            acc_ref[1] += fn_a
            acc_ref[2] += fp_a

        if mask_needed:
            tile_fully_valid = row0 + tile_rows <= rows

            @pl.when(tile_fully_valid)
            def _():
                process(False)          # unmasked fast path

            @pl.when(jnp.logical_not(tile_fully_valid))
            def _():
                process(True)           # masked tail / clamped-redundant tile
        else:
            process(False)

    return kernel


def tversky_loss(pred, target, alpha=0.7, beta=0.3, smooth=1e-05):
    num_cores, max_tile_rows, vmem_limit = _chip_config()

    # Stream in native dtype; cast to f32 inside the kernel.
    pred_flat = pred.reshape(-1)
    target_flat = target.reshape(-1)
    n = pred_flat.shape[0]

    # Only a sub-128 lane tail ever needs a pad so we can reshape to
    # (rows, 128); zero padding is benign for all three sums.
    rem = n % LANES
    if rem:
        pred_flat = jnp.pad(pred_flat, (0, LANES - rem))
        target_flat = jnp.pad(target_flat, (0, LANES - rem))
    rows = pred_flat.shape[0] // LANES
    pred2d = pred_flat.reshape(rows, LANES)
    target2d = target_flat.reshape(rows, LANES)

    # Sublane packing granularity (f32: 8, bf16: 16, int8/fp8: 32); block
    # rows must be a multiple of it for BOTH inputs.
    sub = max(
        8,
        32 // jnp.dtype(pred2d.dtype).itemsize,
        32 // jnp.dtype(target2d.dtype).itemsize,
    )
    tile_rows = min(max_tile_rows, _round_up(rows, sub))
    chunk_rows = min(CHUNK_ROWS, tile_rows)
    steps = pl.cdiv(rows, tile_rows)
    steps_per_core = pl.cdiv(steps, num_cores)
    mask_needed = num_cores * steps_per_core * tile_rows > rows

    def in_index_map(c, i):
        # Clamp so a core/step with no real work re-reads the last valid
        # block; the in-kernel mask zeroes its contribution.
        return (jnp.minimum(c * steps_per_core + i, steps - 1), 0)

    kernel = _make_kernel(rows, tile_rows, steps_per_core, chunk_rows,
                          mask_needed)

    in_bytes = (jnp.dtype(pred2d.dtype).itemsize
                + jnp.dtype(target2d.dtype).itemsize)
    cost = pl.CostEstimate(
        flops=6 * rows * LANES,
        transcendentals=0,
        bytes_accessed=rows * LANES * in_bytes
        + num_cores * 3 * 8 * LANES * 4,
    )

    acc = pl.pallas_call(
        kernel,
        out_shape=jax.ShapeDtypeStruct((num_cores, 3, 8, LANES), jnp.float32),
        grid_spec=pltpu.PrefetchScalarGridSpec(
            num_scalar_prefetch=0,
            grid=(num_cores, steps_per_core),
            in_specs=[
                pl.BlockSpec((tile_rows, LANES), in_index_map),
                pl.BlockSpec((tile_rows, LANES), in_index_map),
            ],
            out_specs=pl.BlockSpec((None, 3, 8, LANES),
                                   lambda c, i: (c, 0, 0, 0)),
        ),
        compiler_params=pltpu.CompilerParams(
            # TODO(synk): on v7x confirm with an xprof trace that axis 0
            # actually shards across both TensorCores; switch to
            # pltpu.CORE_PARALLEL if plain "parallel" does not split it.
            dimension_semantics=("parallel", "arbitrary"),
            vmem_limit_bytes=vmem_limit,
        ),
        cost_estimate=cost,
    )(pred2d, target2d)

    # Tiny final reduction + scalar ratio in plain JAX.
    sums = acc.sum(axis=(0, 2, 3))          # [tp, fn, fp] (direct, no cancellation)
    tp, fn, fp = sums[0], sums[1], sums[2]
    tversky = (tp + smooth) / (tp + alpha * fn + beta * fp + smooth)
    return 1.0 - tversky


if __name__ == "__main__":
    key = jax.random.PRNGKey(0)
    k1, k2 = jax.random.split(key)

    # pred: sigmoid-like probabilities; target: binary mask (NCHW = 2,4,16,16)
    pred = jax.nn.sigmoid(jax.random.normal(k1, (2, 4, 16, 16), dtype=jnp.float32))
    target = (jax.random.uniform(k2, (2, 4, 16, 16)) > 0.5).astype(jnp.float32)

    loss = tversky_loss(pred, target)
    loss = jax.block_until_ready(loss)

    # reference check (plain JAX mirror of the PyTorch module)
    pf = pred.reshape(-1)
    tf = target.reshape(-1)
    tp = jnp.sum(pf * tf)
    fn = jnp.sum(tf * (1 - pf))
    fp = jnp.sum((1 - tf) * pf)
    ref = 1.0 - (tp + 1e-05) / (tp + 0.7 * fn + 0.3 * fp + 1e-05)

    assert jnp.allclose(loss, ref, rtol=1e-4, atol=1e-6), (loss, ref)
    print("KERNEL_OK")
</pallas_src>

<mosaic_0001>
module attributes {stable_mosaic.version = 11 : i64} {
  func.func @kernel(%arg0: i32, %arg1: i32, %arg2: memref<16x128xf32, #tpu.memory_space<vmem>>, %arg3: memref<16x128xf32, #tpu.memory_space<vmem>>, %arg4: memref<1x3x8x128xf32, #tpu.memory_space<vmem>>) attributes {dimension_semantics = [#tpu.dimension_semantics<parallel>, #tpu.dimension_semantics<arbitrary>], iteration_bounds = array<i64: 1, 1>, scalar_prefetch = 0 : i64, scratch_operands = 0 : i64, tpu.core_type = #tpu.core_type<tc>, window_params = [{transform_indices = @transform_0, window_bounds = array<i64: 16, 128>}, {transform_indices = @transform_1, window_bounds = array<i64: 16, 128>}, {transform_indices = @transform_2, window_bounds = array<i64: 1, 3, 8, 128>}]} {
    %c0_i32 = arith.constant 0 : i32
    %0 = arith.cmpi eq, %arg1, %c0_i32 : i32
    %1 = arith.extui %0 : i1 to i32
    %c0_i32_0 = arith.constant 0 : i32
    %2 = arith.cmpi ne, %1, %c0_i32_0 : i32
    scf.if %2 {
      %cst_28 = arith.constant 0.000000e+00 : f32
      %40 = vector.broadcast %cst_28 : f32 to vector<3x8x128xf32>
      %c0_29 = arith.constant 0 : index
      %c0_30 = arith.constant 0 : index
      %c0_31 = arith.constant 0 : index
      %c0_32 = arith.constant 0 : index
      %41 = vector.load %arg4[%c0_29, %c0_30, %c0_31, %c0_32] : memref<1x3x8x128xf32, #tpu.memory_space<vmem>>, vector<1x3x8x128xf32>
      %42 = vector.shape_cast %41 : vector<1x3x8x128xf32> to vector<3x8x128xf32>
      %43 = vector.shape_cast %40 : vector<3x8x128xf32> to vector<1x3x8x128xf32>
      tpu.vector_store %arg4[%c0_29, %c0_30, %c0_31, %c0_32], %43 {strides = array<i32>} : memref<1x3x8x128xf32, #tpu.memory_space<vmem>>, vector<1x3x8x128xf32>,
    } else {
    }
    %cst = arith.constant 0.000000e+00 : f32
    %3 = vector.broadcast %cst : f32 to vector<8x128xf32>
    %c0_i32_1 = arith.constant 0 : i32
    %c16_i32 = arith.constant 16 : i32
    %4 = arith.muli %c0_i32_1, %c16_i32 : i32
    %5 = tpu.assume_multiple %4, 16 : i32
    %6 = arith.index_cast %5 : i32 to index
    %c0 = arith.constant 0 : index
    %7 = vector.load %arg2[%6, %c0] : memref<16x128xf32, #tpu.memory_space<vmem>>, vector<16x128xf32>
    %8 = arith.index_cast %5 : i32 to index
    %c0_2 = arith.constant 0 : index
    %9 = vector.load %arg3[%8, %c0_2] : memref<16x128xf32, #tpu.memory_space<vmem>>, vector<16x128xf32>
    %10 = arith.mulf %7, %9 : vector<16x128xf32>
    %11 = arith.subf %9, %10 : vector<16x128xf32>
    %12 = arith.subf %7, %10 : vector<16x128xf32>
    %13 = vector.shape_cast %10 : vector<16x128xf32> to vector<2x8x128xf32>
    %cst_3 = arith.constant dense<0.000000e+00> : vector<8x128xf32>
    %14 = vector.multi_reduction <add>, %13, %cst_3 [0] : vector<2x8x128xf32> to vector<8x128xf32>
    %15 = arith.addf %3, %14 : vector<8x128xf32>
    %16 = vector.shape_cast %11 : vector<16x128xf32> to vector<2x8x128xf32>
    %cst_4 = arith.constant dense<0.000000e+00> : vector<8x128xf32>
    %17 = vector.multi_reduction <add>, %16, %cst_4 [0] : vector<2x8x128xf32> to vector<8x128xf32>
    %18 = arith.addf %3, %17 : vector<8x128xf32>
    %19 = vector.shape_cast %12 : vector<16x128xf32> to vector<2x8x128xf32>
    %cst_5 = arith.constant dense<0.000000e+00> : vector<8x128xf32>
    %20 = vector.multi_reduction <add>, %19, %cst_5 [0] : vector<2x8x128xf32> to vector<8x128xf32>
    %21 = arith.addf %3, %20 : vector<8x128xf32>
    %c1_i32 = arith.constant 1 : i32
    %c0_6 = arith.constant 0 : index
    %c0_7 = arith.constant 0 : index
    %c0_8 = arith.constant 0 : index
    %c0_9 = arith.constant 0 : index
    %22 = vector.load %arg4[%c0_6, %c0_7, %c0_8, %c0_9] : memref<1x3x8x128xf32, #tpu.memory_space<vmem>>, vector<1x1x8x128xf32>
    %23 = vector.shape_cast %22 : vector<1x1x8x128xf32> to vector<8x128xf32>
    %24 = arith.addf %23, %15 : vector<8x128xf32>
    %c0_10 = arith.constant 0 : index
    %c0_11 = arith.constant 0 : index
    %c0_12 = arith.constant 0 : index
    %c0_13 = arith.constant 0 : index
    %25 = vector.load %arg4[%c0_10, %c0_11, %c0_12, %c0_13] : memref<1x3x8x128xf32, #tpu.memory_space<vmem>>, vector<1x1x8x128xf32>
    %26 = vector.shape_cast %25 : vector<1x1x8x128xf32> to vector<8x128xf32>
    %27 = vector.shape_cast %24 : vector<8x128xf32> to vector<1x1x8x128xf32>
    tpu.vector_store %arg4[%c0_10, %c0_11, %c0_12, %c0_13], %27 {strides = array<i32>} : memref<1x3x8x128xf32, #tpu.memory_space<vmem>>, vector<1x1x8x128xf32>,
    %c0_14 = arith.constant 0 : index
    %c1 = arith.constant 1 : index
    %c0_15 = arith.constant 0 : index
    %c0_16 = arith.constant 0 : index
    %28 = vector.load %arg4[%c0_14, %c1, %c0_15, %c0_16] : memref<1x3x8x128xf32, #tpu.memory_space<vmem>>, vector<1x1x8x128xf32>
    %29 = vector.shape_cast %28 : vector<1x1x8x128xf32> to vector<8x128xf32>
    %30 = arith.addf %29, %18 : vector<8x128xf32>
    %c0_17 = arith.constant 0 : index
    %c1_18 = arith.constant 1 : index
    %c0_19 = arith.constant 0 : index
    %c0_20 = arith.constant 0 : index
    %31 = vector.load %arg4[%c0_17, %c1_18, %c0_19, %c0_20] : memref<1x3x8x128xf32, #tpu.memory_space<vmem>>, vector<1x1x8x128xf32>
    %32 = vector.shape_cast %31 : vector<1x1x8x128xf32> to vector<8x128xf32>
    %33 = vector.shape_cast %30 : vector<8x128xf32> to vector<1x1x8x128xf32>
    tpu.vector_store %arg4[%c0_17, %c1_18, %c0_19, %c0_20], %33 {strides = array<i32>} : memref<1x3x8x128xf32, #tpu.memory_space<vmem>>, vector<1x1x8x128xf32>,
    %c0_21 = arith.constant 0 : index
    %c2 = arith.constant 2 : index
    %c0_22 = arith.constant 0 : index
    %c0_23 = arith.constant 0 : index
    %34 = vector.load %arg4[%c0_21, %c2, %c0_22, %c0_23] : memref<1x3x8x128xf32, #tpu.memory_space<vmem>>, vector<1x1x8x128xf32>
    %35 = vector.shape_cast %34 : vector<1x1x8x128xf32> to vector<8x128xf32>
    %36 = arith.addf %35, %21 : vector<8x128xf32>
    %c0_24 = arith.constant 0 : index
    %c2_25 = arith.constant 2 : index
    %c0_26 = arith.constant 0 : index
    %c0_27 = arith.constant 0 : index
    %37 = vector.load %arg4[%c0_24, %c2_25, %c0_26, %c0_27] : memref<1x3x8x128xf32, #tpu.memory_space<vmem>>, vector<1x1x8x128xf32>
    %38 = vector.shape_cast %37 : vector<1x1x8x128xf32> to vector<8x128xf32>
    %39 = vector.shape_cast %36 : vector<8x128xf32> to vector<1x1x8x128xf32>
    tpu.vector_store %arg4[%c0_24, %c2_25, %c0_26, %c0_27], %39 {strides = array<i32>} : memref<1x3x8x128xf32, #tpu.memory_space<vmem>>, vector<1x1x8x128xf32>,
    return
  }
  func.func @transform_0(%arg0: i32, %arg1: i32) -> (i32, i32) {
    %c1_i32 = arith.constant 1 : i32
    %0 = arith.muli %arg0, %c1_i32 : i32
    %1 = arith.addi %0, %arg1 : i32
    %c0_i32 = arith.constant 0 : i32
    %2 = arith.minsi %1, %c0_i32 : i32
    %c0_i32_0 = arith.constant 0 : i32
    %c0_i32_1 = arith.constant 0 : i32
    return %2, %c0_i32_0 : i32, i32
  }
  func.func @transform_1(%arg0: i32, %arg1: i32) -> (i32, i32) {
    %c1_i32 = arith.constant 1 : i32
    %0 = arith.muli %arg0, %c1_i32 : i32
    %1 = arith.addi %0, %arg1 : i32
    %c0_i32 = arith.constant 0 : i32
    %2 = arith.minsi %1, %c0_i32 : i32
    %c0_i32_0 = arith.constant 0 : i32
    %c0_i32_1 = arith.constant 0 : i32
    return %2, %c0_i32_0 : i32, i32
  }
  func.func @transform_2(%arg0: i32, %arg1: i32) -> (i32, i32, i32, i32) {
    %c0_i32 = arith.constant 0 : i32
    %c0_i32_0 = arith.constant 0 : i32
    %c0_i32_1 = arith.constant 0 : i32
    %c0_i32_2 = arith.constant 0 : i32
    return %arg0, %c0_i32, %c0_i32_0, %c0_i32_1 : i32, i32, i32, i32
  }
}

</mosaic_0001>

<bundles_post_ra>
// kernel: tpu_custom_call.1
= control target key start
LH: loop header
LB: loop body
LE: loop exit
PB: predicated region body
PF: predicated region fallthrough
CT: control target
= control target key end

     0   :  { %7 = vsyncpa [#allocation3], 0  ;;  %s259_s0 = inlined_call_operand.hbm [shape: f32[16,128], index: 0, kind: input, shape index: {}]   ;;  %s260_s1 = inlined_call_operand.hbm [shape: f32[16,128], index: 1, kind: input, shape index: {}]   ;;  %s261_s2 = inlined_call_operand.hbm [shape: f32[1,3,8,128], index: 2, kind: output, shape index: {}]  }
   0x1   :  { %8 = vsyncpa [#allocation6], 0 }
   0x2   :  { %9 = vsyncpa [#allocation4], 0  ;;  %s194_s9 = smov [#allocation2]   ;;  %s122_s13 = scalar_lea.hbm %s259_s0, 256 }
   0x3   :  { %s21_s10 = sshll.u32 %s194_s9, 4  ;;  %p123_p0 = scmp.ne.s32.totalorder %s259_s0, %s122_s13  ;;  %s22_s10 = int_to_ptr.vmem [resolvable:$true] %s21_s10 }
   0x4   :  { %p126_p1 = scmp.lt.u32.totalorder %s122_s13, %s259_s0 }
   0x6   :  { %p128_p2 = pnand %p126_p1, %p123_p0 }
   0x8   :  { %131 = shalt.err (!%p128_p2)
}
   0x9   :  { %s132_s18 = scalar_lea.vmem %s22_s10, 256  ;;  %p137_p4 = scmp.lt.s32.totalorder %s22_s10, %s22_s10 }
   0xa   :  { %p133_p3 = scmp.ne.s32.totalorder %s22_s10, %s132_s18  ;;  %p138_p5 = scmp.lt.s32.totalorder %s132_s18, %s132_s18 }
   0xc   :  { %p139_p6 = por %p138_p5, %p137_p4 }
   0xe   :  { %p140_p7 = pnand %p139_p6, %p133_p3 }
  0x10   :  { %143 = shalt.err (!%p140_p7)
}
  0x11   :  { %s195_s19 = smov 128   ;;  %s196_s20 = smov 8  }
  0x12   :  { %27 = dma.hbm_to_vmem [thread:$0]  %s259_s0, 256, %s22_s10, [#allocation3], %s195_s19, %s195_s19, %s196_s20  }
  0x13   :  { %s197_s23 = smov [#allocation5]   ;;  %s144_s27 = scalar_lea.hbm %s260_s1, 256 }
  0x14   :  { %s39_s24 = sshll.u32 %s197_s23, 4  ;;  %p145_p8 = scmp.ne.s32.totalorder %s260_s1, %s144_s27  ;;  %s40_s24 = int_to_ptr.vmem [resolvable:$true] %s39_s24 }
  0x15   :  { %p148_p9 = scmp.lt.u32.totalorder %s144_s27, %s260_s1 }
  0x17   :  { %p150_p10 = pnand %p148_p9, %p145_p8 }
  0x19   :  { %153 = shalt.err (!%p150_p10)
}
  0x1a   :  { %s154_s4 = scalar_lea.vmem %s40_s24, 256  ;;  %p159_p12 = scmp.lt.s32.totalorder %s40_s24, %s40_s24 }
  0x1b   :  { %p155_p11 = scmp.ne.s32.totalorder %s40_s24, %s154_s4  ;;  %p160_p13 = scmp.lt.s32.totalorder %s154_s4, %s154_s4 }
  0x1d   :  { %p161_p0 = por %p160_p13, %p159_p12 }
  0x1f   :  { %p162_p1 = pnand %p161_p0, %p155_p11 }
  0x21   :  { %165 = shalt.err (!%p162_p1)
}
  0x22   :  { %45 = dma.hbm_to_vmem [thread:$0]  %s260_s1, 256, %s40_s24, [#allocation6], %s195_s19, %s195_s19, %s196_s20  }
  0x23   :  { %188 = dma.done.wait [#allocation3], 256  }
  0x24   :  { %189 = vsyncadd [#allocation3], 4294967040 }
  0x25   :  { %190 = dma.done.wait [#allocation6], 256  }
  0x26   :  { %191 = vsyncadd [#allocation6], 4294967040  ;;  %v67_v0 = vld [vmem:[#allocation2] sm:$0xff]  ;;  %v68_v1 = vld [vmem:[#allocation2 + $0x8] sm:$0xff]  ;;  %s198_s6 = smov [#allocation7]  }
  0x27   :  { %v69_v2 = vld [vmem:[#allocation5] sm:$0xff]  ;;  %v70_v3 = vld [vmem:[#allocation5 + $0x8] sm:$0xff]  ;;  %s99_s7 = sshll.u32 %s198_s6, 4  ;;  %s100_s7 = int_to_ptr.vmem [resolvable:$true] %s99_s7 }
  0x28   :  { %v71_v4 = vmul.f32 %v69_v2, %v67_v0  ;;  %v72_v5 = vmul.f32 %v70_v3, %v68_v1  ;;  %s166_s1 = scalar_lea.vmem %s100_s7, 384  ;;  %p171_p3 = scmp.lt.s32.totalorder %s100_s7, %s100_s7 }
  0x29   :  { %p167_p2 = scmp.ne.s32.totalorder %s100_s7, %s166_s1  ;;  %p172_p4 = scmp.lt.s32.totalorder %s166_s1, %s166_s1 }
  0x2a   :  { %v73_v6 = vsub.f32 %v69_v2, %v71_v4  ;;  %v75_v7 = vsub.f32 %v67_v0, %v71_v4  ;;  %v77_v8 = vadd.f32 %v72_v5, %v71_v4  ;;  %v74_v9 = vsub.f32 %v70_v3, %v72_v5 }
  0x2b   :  { %v76_v10 = vsub.f32 %v68_v1, %v72_v5  ;;  %p173_p5 = por %p172_p4, %p171_p3 }
  0x2c   :  { %v79_v11 = vadd.f32 %v74_v9, %v73_v6  ;;  %85 = vst [vmem:[#allocation7] sm:$0xff] %v77_v8 }
  0x2d   :  { %v81_v12 = vadd.f32 %v76_v10, %v75_v7  ;;  %p174_p6 = pnand %p173_p5, %p167_p2 }
  0x2e   :  { %89 = vst [vmem:[#allocation7 + $0x8] sm:$0xff] %v79_v11 }
  0x2f   :  { %93 = vst [vmem:[#allocation7 + $0x10] sm:$0xff] %v81_v12 }
  0x30   :  { %177 = shalt.err (!%p174_p6)
}
  0x31   :  { %s178_s10 = scalar_lea.hbm %s261_s2, 384 }
  0x32   :  { %p179_p7 = scmp.ne.s32.totalorder %s261_s2, %s178_s10  ;;  %p182_p8 = scmp.lt.u32.totalorder %s178_s10, %s261_s2 }
  0x34   :  { %p184_p9 = pnand %p182_p8, %p179_p7 }
  0x36   :  { %187 = shalt.err (!%p184_p9)
}
  0x37   :  { %105 = dma.vmem_to_hbm [thread:$0]  %s100_s7, 384, %s261_s2, [#allocation4], %s195_s19, %s195_s19, %s196_s20  }
  0x38   :  { %192 = dma.done.wait [#allocation4], 384  }
  0x39   :  { %193 = vsyncadd [#allocation4], 4294966912 }
  0x3a   :  { %109 = vsyncpa [#allocation3], 1 }
  0x3b   :  { %110 = vsyncpa [#allocation6], 1 }
  0x3c   :  { %111 = vsyncpa [#allocation4], 1 }

</bundles_post_ra>
